<compile_context>
chip_gen: v7x
topology: tpu7x:2x2x1
jax: 0.10.0
libtpu: 0.0.40
codegen_flags: <defaults>
</compile_context>

<pallas_src>
import jax
import jax.numpy as jnp
from jax.experimental import pallas as pl
from jax.experimental.pallas import tpu as pltpu


def _round_up(x, m):
    return ((x + m - 1) // m) * m


def _cdiv(a, b):
    return -(-a // b)


_TB_CAP = 4096  # rows per grid step; ~1.5 MiB of useful HBM traffic (f32)


def _pick_batch_tile(B, cap=_TB_CAP):
    """Batch tile: multiple of 8, <= cap, aiming for an even number of grid
    steps (>= 2 whenever B spans more than one sublane granule) so v7x's two
    TensorCores get balanced work under dimension_semantics=("parallel",)."""
    n_pairs = max(1, _cdiv(B, 2 * cap))          # number of (step-pairs)
    tb = _round_up(_cdiv(B, 2 * n_pairs), 8)     # rows per step, 8-aligned
    return max(8, min(cap, tb))


def feature_kernel(img_ref, ray_ref, w1a_ref, w1b_ref, b1_ref,
                   w2_ref, b2_ref, o_ref):
    # fc1 with fused concat: image @ W1a + ray @ W1b  (f32 MXU accumulation)
    h = jnp.dot(img_ref[...], w1a_ref[...], preferred_element_type=jnp.float32)
    h = h + jnp.dot(ray_ref[...], w1b_ref[...],
                    preferred_element_type=jnp.float32)
    h = jnp.maximum(h + b1_ref[...], 0.0)            # bias + ReLU in f32
    # fc2 (cast is a no-op for f32 weights; keeps bf16-weight path explicit)
    y = jnp.dot(h.astype(w2_ref.dtype), w2_ref[...],
                preferred_element_type=jnp.float32)
    o_ref[...] = (y + b2_ref[...]).astype(o_ref.dtype)


def feature_forward(image, ray, w1, b1, w2, b2, *, block_rows=_TB_CAP):
    """image: (B, d_img), ray: (B, d_ray), d_img + d_ray == w1.shape[0]."""
    B, d_img = image.shape
    d_ray = ray.shape[1]
    assert d_img + d_ray == w1.shape[0]
    d_hid = w1.shape[1]
    d_out = w2.shape[1]
    out_dtype = image.dtype

    # Split W1 once (tiny slices, done by XLA outside the kernel).
    w1a = w1[:d_img, :]
    w1b = w1[d_img:, :]

    # Large batch tile; ragged tail handled by Pallas partial-block masking
    # (no jnp.pad -> no extra HBM pass over the inputs).
    TB = _pick_batch_tile(B, block_rows)
    grid = (pl.cdiv(B, TB),)

    batch_spec = lambda d: pl.BlockSpec((TB, d), lambda i: (i, 0))
    const_spec = lambda shape: pl.BlockSpec(shape, lambda i: (0, 0))

    flops = 2 * B * (d_img * d_hid + d_ray * d_hid + d_hid * d_out)
    bytes_accessed = (
        B * (d_img + d_ray + d_out) * image.dtype.itemsize
        + (w1.size + b1.size + w2.size + b2.size) * w1.dtype.itemsize
    )

    return pl.pallas_call(
        feature_kernel,
        out_shape=jax.ShapeDtypeStruct((B, d_out), out_dtype),
        grid=grid,
        in_specs=[
            batch_spec(d_img),           # image (TB, d_img)
            batch_spec(d_ray),           # ray   (TB, d_ray)
            const_spec((d_img, d_hid)),  # W1a   (32, 64)   VMEM-resident
            const_spec((d_ray, d_hid)),  # W1b   (32, 64)   VMEM-resident
            const_spec((1, d_hid)),      # b1    (1, 64)
            const_spec((d_hid, d_out)),  # W2    (64, 32)
            const_spec((1, d_out)),      # b2    (1, 32)
        ],
        out_specs=batch_spec(d_out),     # out   (TB, 32)
        compiler_params=pltpu.CompilerParams(
            dimension_semantics=("parallel",)),
        cost_estimate=pl.CostEstimate(
            flops=flops, transcendentals=0, bytes_accessed=bytes_accessed),
    )(image, ray, w1a, w1b, b1, w2, b2)


def _ref_forward(image, ray, w1, b1, w2, b2):
    x = jnp.concatenate([image, ray], axis=1)
    h = jnp.maximum(x @ w1 + b1, 0.0)
    return h @ w2 + b2


if __name__ == "__main__":
    key = jax.random.PRNGKey(0)
    k_img, k_ray, k_w1, k_b1, k_w2, k_b2 = jax.random.split(key, 6)

    d_img, d_ray = 32, 32                  # concat -> 64 = fc1.in_features

    # Deterministic parameter init (PyTorch Linear-style uniform bounds),
    # stored as (in, out) — i.e. W.T relative to torch's (out, in).
    def linear_params(kw, kb, fan_in, fan_out):
        bound = 1.0 / jnp.sqrt(fan_in)
        w = jax.random.uniform(kw, (fan_in, fan_out), jnp.float32, -bound, bound)
        b = jax.random.uniform(kb, (1, fan_out), jnp.float32, -bound, bound)
        return w, b

    w1, b1 = linear_params(k_w1, k_b1, 64, 64)
    w2, b2 = linear_params(k_w2, k_b2, 64, 32)

    def check(B, kx, ky):
        image = jax.random.normal(kx, (B, d_img), dtype=jnp.float32)
        ray = jax.random.normal(ky, (B, d_ray), dtype=jnp.float32)
        out = jax.block_until_ready(
            feature_forward(image, ray, w1, b1, w2, b2))
        ref = _ref_forward(image, ray, w1, b1, w2, b2)
        assert out.shape == (B, 32), out.shape
        assert jnp.allclose(out, ref, atol=1e-5, rtol=1e-5), f"mismatch B={B}"

    # Small aligned batch (single grid step).
    check(8, k_img, k_ray)
    # Ragged batch (exercises 2-step grid with masked partial final block).
    check(13, k_ray, k_img)
    # Larger batch (2 even grid steps, partial second block, no padding pass).
    check(72, k_img, k_ray)

    print("KERNEL_OK")
</pallas_src>

<mosaic_0001>
module attributes {stable_mosaic.version = 11 : i64} {
  func.func @feature_kernel(%arg0: i32, %arg1: memref<8x32xf32, #tpu.memory_space<vmem>>, %arg2: memref<8x32xf32, #tpu.memory_space<vmem>>, %arg3: memref<32x64xf32, #tpu.memory_space<vmem>>, %arg4: memref<32x64xf32, #tpu.memory_space<vmem>>, %arg5: memref<1x64xf32, #tpu.memory_space<vmem>>, %arg6: memref<64x32xf32, #tpu.memory_space<vmem>>, %arg7: memref<1x32xf32, #tpu.memory_space<vmem>>, %arg8: memref<8x32xf32, #tpu.memory_space<vmem>>) attributes {dimension_semantics = [#tpu.dimension_semantics<parallel>], iteration_bounds = array<i64: 1>, scalar_prefetch = 0 : i64, scratch_operands = 0 : i64, tpu.core_type = #tpu.core_type<tc>, window_params = [{transform_indices = @transform_0, window_bounds = array<i64: 8, 32>}, {transform_indices = @transform_1, window_bounds = array<i64: 8, 32>}, {pipeline_mode = #tpu.pipeline_mode<synchronous>, transform_indices = @transform_2, window_bounds = array<i64: 32, 64>}, {pipeline_mode = #tpu.pipeline_mode<synchronous>, transform_indices = @transform_3, window_bounds = array<i64: 32, 64>}, {pipeline_mode = #tpu.pipeline_mode<synchronous>, transform_indices = @transform_4, window_bounds = array<i64: 1, 64>}, {pipeline_mode = #tpu.pipeline_mode<synchronous>, transform_indices = @transform_5, window_bounds = array<i64: 64, 32>}, {pipeline_mode = #tpu.pipeline_mode<synchronous>, transform_indices = @transform_6, window_bounds = array<i64: 1, 32>}, {transform_indices = @transform_7, window_bounds = array<i64: 8, 32>}]} {
    %c0 = arith.constant 0 : index
    %c0_0 = arith.constant 0 : index
    %0 = vector.load %arg1[%c0, %c0_0] : memref<8x32xf32, #tpu.memory_space<vmem>>, vector<8x32xf32>
    %c0_1 = arith.constant 0 : index
    %c0_2 = arith.constant 0 : index
    %1 = vector.load %arg3[%c0_1, %c0_2] : memref<32x64xf32, #tpu.memory_space<vmem>>, vector<32x64xf32>
    %cst = arith.constant dense<0.000000e+00> : vector<8x64xf32>
    %2 = tpu.matmul %0, %1, %cst {dimension_numbers = #tpu.dot_dimension_numbers<[1], [0], [0], [1], [0, 0, 1, 1], [], []>} : vector<8x32xf32>, vector<32x64xf32>, vector<8x64xf32> -> vector<8x64xf32>
    %c0_3 = arith.constant 0 : index
    %c0_4 = arith.constant 0 : index
    %3 = vector.load %arg2[%c0_3, %c0_4] : memref<8x32xf32, #tpu.memory_space<vmem>>, vector<8x32xf32>
    %c0_5 = arith.constant 0 : index
    %c0_6 = arith.constant 0 : index
    %4 = vector.load %arg4[%c0_5, %c0_6] : memref<32x64xf32, #tpu.memory_space<vmem>>, vector<32x64xf32>
    %cst_7 = arith.constant dense<0.000000e+00> : vector<8x64xf32>
    %5 = tpu.matmul %3, %4, %cst_7 {dimension_numbers = #tpu.dot_dimension_numbers<[1], [0], [0], [1], [0, 0, 1, 1], [], []>} : vector<8x32xf32>, vector<32x64xf32>, vector<8x64xf32> -> vector<8x64xf32>
    %6 = arith.addf %2, %5 : vector<8x64xf32>
    %c0_8 = arith.constant 0 : index
    %c0_9 = arith.constant 0 : index
    %7 = vector.load %arg5[%c0_8, %c0_9] : memref<1x64xf32, #tpu.memory_space<vmem>>, vector<1x64xf32>
    %8 = vector.broadcast %7 : vector<1x64xf32> to vector<8x64xf32>
    %9 = arith.addf %6, %8 : vector<8x64xf32>
    %cst_10 = arith.constant 0.000000e+00 : f32
    %10 = vector.broadcast %cst_10 : f32 to vector<8x64xf32>
    %11 = arith.maximumf %9, %10 : vector<8x64xf32>
    %c0_11 = arith.constant 0 : index
    %c0_12 = arith.constant 0 : index
    %12 = vector.load %arg6[%c0_11, %c0_12] : memref<64x32xf32, #tpu.memory_space<vmem>>, vector<64x32xf32>
    %cst_13 = arith.constant dense<0.000000e+00> : vector<8x32xf32>
    %13 = tpu.matmul %11, %12, %cst_13 {dimension_numbers = #tpu.dot_dimension_numbers<[1], [0], [0], [1], [0, 0, 1, 1], [], []>} : vector<8x64xf32>, vector<64x32xf32>, vector<8x32xf32> -> vector<8x32xf32>
    %c0_14 = arith.constant 0 : index
    %c0_15 = arith.constant 0 : index
    %14 = vector.load %arg7[%c0_14, %c0_15] : memref<1x32xf32, #tpu.memory_space<vmem>>, vector<1x32xf32>
    %15 = vector.broadcast %14 : vector<1x32xf32> to vector<8x32xf32>
    %16 = arith.addf %13, %15 : vector<8x32xf32>
    %c0_16 = arith.constant 0 : index
    %c0_17 = arith.constant 0 : index
    %17 = vector.load %arg8[%c0_16, %c0_17] : memref<8x32xf32, #tpu.memory_space<vmem>>, vector<8x32xf32>
    tpu.vector_store %arg8[%c0_16, %c0_17], %16 {strides = array<i32>} : memref<8x32xf32, #tpu.memory_space<vmem>>, vector<8x32xf32>,
    return
  }
  func.func @transform_0(%arg0: i32) -> (i32, i32) {
    %c0_i32 = arith.constant 0 : i32
    %c0_i32_0 = arith.constant 0 : i32
    return %arg0, %c0_i32 : i32, i32
  }
  func.func @transform_1(%arg0: i32) -> (i32, i32) {
    %c0_i32 = arith.constant 0 : i32
    %c0_i32_0 = arith.constant 0 : i32
    return %arg0, %c0_i32 : i32, i32
  }
  func.func @transform_2(%arg0: i32) -> (i32, i32) {
    %c0_i32 = arith.constant 0 : i32
    %c0_i32_0 = arith.constant 0 : i32
    %c0_i32_1 = arith.constant 0 : i32
    return %c0_i32, %c0_i32_0 : i32, i32
  }
  func.func @transform_3(%arg0: i32) -> (i32, i32) {
    %c0_i32 = arith.constant 0 : i32
    %c0_i32_0 = arith.constant 0 : i32
    %c0_i32_1 = arith.constant 0 : i32
    return %c0_i32, %c0_i32_0 : i32, i32
  }
  func.func @transform_4(%arg0: i32) -> (i32, i32) {
    %c0_i32 = arith.constant 0 : i32
    %c0_i32_0 = arith.constant 0 : i32
    %c0_i32_1 = arith.constant 0 : i32
    return %c0_i32, %c0_i32_0 : i32, i32
  }
  func.func @transform_5(%arg0: i32) -> (i32, i32) {
    %c0_i32 = arith.constant 0 : i32
    %c0_i32_0 = arith.constant 0 : i32
    %c0_i32_1 = arith.constant 0 : i32
    return %c0_i32, %c0_i32_0 : i32, i32
  }
  func.func @transform_6(%arg0: i32) -> (i32, i32) {
    %c0_i32 = arith.constant 0 : i32
    %c0_i32_0 = arith.constant 0 : i32
    %c0_i32_1 = arith.constant 0 : i32
    return %c0_i32, %c0_i32_0 : i32, i32
  }
  func.func @transform_7(%arg0: i32) -> (i32, i32) {
    %c0_i32 = arith.constant 0 : i32
    %c0_i32_0 = arith.constant 0 : i32
    return %arg0, %c0_i32 : i32, i32
  }
}

</mosaic_0001>

<bundles_post_ra>
// kernel: tpu_custom_call.1
= control target key start
LH: loop header
LB: loop body
LE: loop exit
PB: predicated region body
PF: predicated region fallthrough
CT: control target
= control target key end

     0   :  { %v414_v3 = vmov 0.0|0.0   ;;  %vm415_vm0 = vmmov 0   ;;  %v416_v6 = vmov 0.0   ;;  %s536_s0 = inlined_call_operand.vmem [shape: f32[8,32], index: 0, kind: input, shape index: {}]   ;;  %s537_s1 = inlined_call_operand.vmem [shape: f32[8,32], index: 1, kind: input, shape index: {}]   ;;  %s538_s2 = inlined_call_operand.vmem [shape: f32[32,64], index: 2, kind: input, shape index: {}]   ;;  %s539_s3 = inlined_call_operand.vmem [shape: f32[32,64], index: 3, kind: input, shape index: {}]   ;;  %s540_s4 = inlined_call_operand.vmem [shape: f32[1,64], index: 4, kind: input, shape index: {}]   ;;  %s541_s5 = inlined_call_operand.vmem [shape: f32[64,32], index: 5, kind: input, shape index: {}]   ;;  %s542_s6 = inlined_call_operand.vmem [shape: f32[1,32], index: 6, kind: input, shape index: {}]   ;;  %s543_s7 = inlined_call_operand.hbm [shape: f32[8,32], index: 7, kind: output, shape index: {}]  }
   0x1   :  { %v33_v0 = vld [vmem:[%s539_s3] sm:$0xff]  ;;  %v34_v1 = vld [vmem:[%s539_s3 + $0x8] sm:$0xff]  ;;  %v35_v2 = vld [vmem:[%s539_s3 + $0x10] sm:$0xff]  ;;  %362 = vmatprep.subr.bf16.mxu1 %v414_v3  ;;  %329 = vmatprep.mubr.msk.f32.mxu1 %vm415_vm0, %v416_v6 }
   0x2   :  { %v363_v4 = vpack.c.bf16 %v34_v1, %v33_v0  ;;  %v36_v5 = vld [vmem:[%s539_s3 + $0x18] sm:$0xff]  ;;  %374 = vmatprep.subr.bf16.mxu0 %v414_v3  ;;  %359 = vmatprep.mubr.msk.f32.mxu0 %vm415_vm0, %v416_v6 }
   0x3   :  { %v366_v7 = vpack.c.bf16 %v36_v5, %v35_v2 }
   0x4   :  { %364 = vmatpush3.bf16.msra.mxu1 %v363_v4 }
   0x5   :  { %12 = vsyncpa [#allocation3], 0  ;;  %365 = vmatprep.subr.bf16.mxu1 %v414_v3  ;;  %v28_v8 = vld [vmem:[%s538_s2] sm:$0xff]  ;;  %v29_v9 = vld [vmem:[%s538_s2 + $0x8] sm:$0xff]  ;;  %vm37_vm1 = vcmask 261120   ;;  %vm208_vm2 = vcmask 523264  }
   0x6   :  { %v32_v10 = vld [vmem:[%s537_s1] sm:$0xff]  ;;  %v369_v11 = vpack.c.bf16 %v29_v9, %v28_v8  ;;  %v30_v12 = vld [vmem:[%s538_s2 + $0x10] sm:$0xff]  ;;  %v31_v13 = vld [vmem:[%s538_s2 + $0x18] sm:$0xff] }
   0x7   :  { %v372_v14 = vpack.c.bf16 %v31_v13, %v30_v12  ;;  %v27_v15 = vld [vmem:[%s536_s0] sm:$0xff]  ;;  %v194_v17 = vld [vmem:[%s541_s5 + $0x8] sm:$0xff]  ;;  %v195_v19 = vld [vmem:[%s541_s5 + $0x10] sm:$0xff] }
   0x8   :  { %367 = vmatpush3.bf16.msra.mxu1 %v366_v7  ;;  %v193_v16 = vld [vmem:[%s541_s5] sm:$0xff]  ;;  %v196_v20 = vld [vmem:[%s541_s5 + $0x18] sm:$0xff]  ;;  %v198_v23 = vld [vmem:[%s541_s5 + $0x28] sm:$0xff] }
   0x9   :  { %368 = vmatprep.subr.bf16.mxu1 %v414_v3  ;;  %v375_v18 = vpack.c.bf16 %v194_v17, %v193_v16  ;;  %v378_v21 = vpack.c.bf16 %v196_v20, %v195_v19  ;;  %v197_v22 = vld [vmem:[%s541_s5 + $0x20] sm:$0xff]  ;;  %v199_v25 = vld [vmem:[%s541_s5 + $0x30] sm:$0xff]  ;;  %v200_v26 = vld [vmem:[%s541_s5 + $0x38] sm:$0xff]  ;;  %s417_s5 = smov [#allocation2]  }
   0xa   :  { %v381_v24 = vpack.c.bf16 %v198_v23, %v197_v22  ;;  %v384_v27 = vpack.c.bf16 %v200_v26, %v199_v25  ;;  %v299_v31 = vld [vmem:[%s540_s4] ss:$0 sm:$0xff]  ;;  %s289_s13 = sshll.u32 %s417_s5, 4  ;;  %s290_s13 = int_to_ptr.vmem [resolvable:$true] %s289_s13 }
   0xb   :  { %330 = vmatmul.mubr.msk.f32.vlgmr.msra.gmra.mrb[0].mxu1 %vm37_vm1, %v32_v10  ;;  %376 = vmatpush3.bf16.msra.mxu0 %v375_v18  ;;  %v300_v36 = vld [vmem:[%s542_s6] ss:$0 sm:$0xff]  ;;  %s390_s14 = scalar_lea.vmem %s290_s13, 128  ;;  %p395_p1 = scmp.lt.s32.totalorder %s290_s13, %s290_s13 }
   0xc   :  { %370 = vmatpush3.bf16.msra.mxu1 %v369_v11  ;;  %340 = vmatprep.mubr.msk.f32.mxu1 %vm415_vm0, %v416_v6  ;;  %p391_p0 = scmp.ne.s32.totalorder %s290_s13, %s390_s14  ;;  %p396_p2 = scmp.lt.s32.totalorder %s390_s14, %s390_s14 }
   0xd   :  { %371 = vmatprep.subr.bf16.mxu1 %v414_v3  ;;  %377 = vmatprep.subr.bf16.mxu0 %v414_v3 }
   0xe   :  { %p397_p3 = por %p396_p2, %p395_p1 }
   0xf   :  { %379 = vmatpush3.bf16.msra.mxu0 %v378_v21 }
  0x10   :  { %373 = vmatpush3.bf16.msra.mxu1 %v372_v14  ;;  %380 = vmatprep.subr.bf16.mxu0 %v414_v3  ;;  %p398_p4 = pnand %p397_p3, %p391_p0 }
  0x13   :  { %341 = vmatmul.mubr.msk.f32.vlgmr.msra.gmra.mrb[2].mxu1 %vm37_vm1, %v27_v15  ;;  %382 = vmatpush3.bf16.msra.mxu0 %v381_v24 }
  0x14   :  { %383 = vmatprep.subr.bf16.mxu0 %v414_v3 }
  0x17   :  { %385 = vmatpush3.bf16.msra.mxu0 %v384_v27 }
  0xde   :  { %v107_v28 = vpop.f32.mrb[0].mxu1 }
  0xdf   :  { %v331_v29 = vpop.f32.mrb[1].mxu1 }
  0xe6   :  { %v180_v30 = vpop.f32.mrb[2].mxu1 }
  0xe7   :  { %v181_v32 = vadd.f32 %v180_v30, %v107_v28  ;;  %v342_v33 = vpop.f32.mrb[3].mxu1 }
  0xe9   :  { %v191_v34 = vadd.f32 %v299_v31, %v181_v32 }
  0xeb   :  { %v192_v35 = vmax.f32 %v191_v34, 0.0 }
  0xed   :  { %360 = vmatmul.mubr.msk.f32.vlgmr.msra.gmra.mrb[0].mxu0 %vm208_vm2, %v192_v35 }
 0x1c0   :  { %v278_v37 = vpop.f32.mrb[0].mxu0 }
 0x1c1   :  { %v279_v38 = vadd.f32 %v300_v36, %v278_v37  ;;  %v361_v39 = vpop.f32.mrb[1].mxu0 }
 0x1c3   :  { %282 = vst.msk [vmem:[#allocation2] sm:$0xff] %vm37_vm1, %v279_v38 }
 0x1c4   :  { %401 = shalt.err (!%p398_p4)
}
 0x1c5   :  { %s402_s16 = scalar_lea.hbm %s543_s7, 128 }
 0x1c6   :  { %p403_p5 = scmp.ne.s32.totalorder %s543_s7, %s402_s16  ;;  %p406_p6 = scmp.lt.u32.totalorder %s402_s16, %s543_s7 }
 0x1c8   :  { %p408_p7 = pnand %p406_p6, %p403_p5 }
 0x1ca   :  { %411 = shalt.err (!%p408_p7)
}
 0x1cb   :  { %292 = dma.vmem_to_hbm [thread:$0]  %s290_s13, 128, %s543_s7, [#allocation3]  }
 0x1cc   :  { %412 = dma.done.wait [#allocation3], 128  }
 0x1cd   :  { %413 = vsyncadd [#allocation3], 4294967168 }
 0x1ce   :  { %296 = vsyncpa [#allocation3], 1 }

</bundles_post_ra>
